<compile_context>
chip_gen: v7x
topology: tpu7x:2x2x1
jax: 0.10.0
libtpu: 0.0.40
codegen_flags: <defaults>
</compile_context>

<pallas_src>
import functools

import jax
import jax.numpy as jnp
import numpy as np
from jax.experimental import pallas as pl
from jax.experimental.pallas import tpu as pltpu

EPS = 1e-5


def _convblock_kernel(p_ref, w_ref, b_ref, o_ref, *, hw_tile):
    # p_ref: (1, K, hw_tile)    bf16 im2col patch tile (lane axis = HW)
    # w_ref: (Cout_pad, K)      bf16 flattened conv weights (resident)
    # b_ref: (Cout_pad, 1)      f32 conv bias (resident)
    # o_ref: (1, Cout_pad, HW)  f32 output block, resident across the HW-tile axis
    t = pl.program_id(1)

    # Conv for this HW tile as one MXU matmul (f32 accumulate) + bias.
    y = jnp.dot(w_ref[...], p_ref[0], preferred_element_type=jnp.float32)
    y = y + b_ref[...]                                   # (Cout_pad, hw_tile) f32

    col = t * hw_tile
    if hw_tile % 128 == 0:
        col = pl.multiple_of(col, 128)
    o_ref[0, :, pl.ds(col, hw_tile)] = y

    # After the last HW tile the full (un-normalized) conv output of this image
    # is resident in VMEM: compute exact per-channel stats, normalize, ReLU.
    @pl.when(t == pl.num_programs(1) - 1)
    def _():
        y_full = o_ref[0]                                # (Cout_pad, HW) f32
        mean = jnp.mean(y_full, axis=-1, keepdims=True)
        centered = y_full - mean
        var = jnp.mean(centered * centered, axis=-1, keepdims=True)
        y_norm = centered * jax.lax.rsqrt(var + EPS)
        o_ref[0] = jnp.maximum(y_norm, 0.0).astype(o_ref.dtype)


def _im2col(x, kh, kw, stride, padding):
    """x: (N, C, H, W) -> patches (N, C*kh*kw, Ho*Wo) with (C, kh, kw) feature order."""
    n, c, h, w = x.shape
    xp = jnp.pad(x, ((0, 0), (0, 0), (padding, padding), (padding, padding)))
    ho = (h + 2 * padding - kh) // stride + 1
    wo = (w + 2 * padding - kw) // stride + 1
    cols = []
    for i in range(kh):
        for j in range(kw):
            cols.append(xp[:, :, i:i + stride * ho:stride, j:j + stride * wo:stride])
    # (N, kh*kw, C, Ho, Wo) -> (N, C, kh*kw, Ho, Wo) -> (N, C*kh*kw, Ho*Wo)
    p = jnp.stack(cols, axis=1).transpose(0, 2, 1, 3, 4).reshape(n, c * kh * kw, ho * wo)
    return p, ho, wo


def _pick_hw_tile(hw, max_tile=2048):
    """Largest multiple of 128 that divides hw and is <= max_tile; else hw itself."""
    if hw % 128 != 0:
        return hw
    best, t = 128, 128
    while t <= min(hw, max_tile):
        if hw % t == 0:
            best = t
        t += 128
    return best


@functools.partial(jax.jit, static_argnames=("stride", "padding", "hw_tile"))
def conv_block_forward(x, weight, bias, *, stride=1, padding=0, hw_tile=None):
    """ConvBlock forward. x: (N, Cin, H, W) NCHW; weight: (Cout, Cin, KH, KW)."""
    n, cin, _, _ = x.shape
    cout, _, kh, kw = weight.shape

    patches, ho, wo = _im2col(x, kh, kw, stride, padding)    # (N, K, HW)
    hw = ho * wo
    k = cin * kh * kw

    if hw_tile is None:
        hw_tile = _pick_hw_tile(hw)
    if hw % hw_tile != 0 or not (hw_tile == hw or hw_tile % 128 == 0):
        raise ValueError(f"bad hw_tile={hw_tile} for hw={hw}")
    num_t = hw // hw_tile

    cout_pad = ((cout + 7) // 8) * 8

    # bf16 operands for the MXU; bias and all norm math stay f32.
    p_bf16 = patches.astype(jnp.bfloat16)
    w_mat = jnp.pad(weight.reshape(cout, k).astype(jnp.bfloat16),
                    ((0, cout_pad - cout), (0, 0)))          # (Cout_pad, K)
    b_mat = jnp.pad(bias.astype(jnp.float32), (0, cout_pad - cout)).reshape(cout_pad, 1)

    # VMEM budget: double-buffered patch tile + resident output + weights/bias.
    needed = (2 * (k * hw_tile * 2)          # patch tiles (bf16, double-buffered)
              + 2 * (cout_pad * hw * 4)      # output block (f32)
              + 2 * (cout_pad * k * 2)       # weights (bf16)
              + 2 * (cout_pad * 4))          # bias (f32)
    vmem_limit = int(min(max(2 * needed + (2 << 20), 32 << 20), 56 << 20))

    cost = pl.CostEstimate(
        flops=2 * n * hw * k * cout_pad + 6 * n * cout_pad * hw,
        transcendentals=n * cout_pad,
        bytes_accessed=(p_bf16.size * 2 + w_mat.size * 2 + b_mat.size * 4
                        + n * cout_pad * hw * 4),
    )

    out = pl.pallas_call(
        functools.partial(_convblock_kernel, hw_tile=hw_tile),
        out_shape=jax.ShapeDtypeStruct((n, cout_pad, hw), jnp.float32),
        grid_spec=pltpu.PrefetchScalarGridSpec(
            num_scalar_prefetch=0,
            grid=(n, num_t),
            in_specs=[
                pl.BlockSpec((1, k, hw_tile), lambda b, t: (b, 0, t)),
                pl.BlockSpec((cout_pad, k), lambda b, t: (0, 0)),   # resident weights
                pl.BlockSpec((cout_pad, 1), lambda b, t: (0, 0)),   # resident bias
            ],
            out_specs=pl.BlockSpec((1, cout_pad, hw), lambda b, t: (b, 0, 0)),
        ),
        compiler_params=pltpu.CompilerParams(
            dimension_semantics=("parallel", "arbitrary"),
            vmem_limit_bytes=vmem_limit,
        ),
        cost_estimate=cost,
    )(p_bf16, w_mat, b_mat)

    # (N, Cout_pad, HW) -> NCHW: strip channel padding + free reshape (no transpose).
    return out[:, :cout, :].reshape(n, cout, ho, wo)


def _reference_forward(x, weight, bias, stride, padding):
    """Pure-JAX f32 reference: conv2d + InstanceNorm2d(training, no affine) + ReLU."""
    y = jax.lax.conv_general_dilated(
        x, weight, window_strides=(stride, stride),
        padding=[(padding, padding), (padding, padding)],
        dimension_numbers=("NCHW", "OIHW", "NCHW"),
        precision=jax.lax.Precision.HIGHEST,
    ) + bias.reshape(1, -1, 1, 1)
    mean = jnp.mean(y, axis=(2, 3), keepdims=True)
    var = jnp.mean((y - mean) ** 2, axis=(2, 3), keepdims=True)
    y = (y - mean) * jax.lax.rsqrt(var + EPS)
    return jnp.maximum(y, 0.0)


if __name__ == "__main__":
    # ConvBlock(in_dimension=4, out_dimension=8, kernel_size=3, stride=1, padding=1)
    N, CIN, COUT, H, W, KS = 2, 4, 8, 16, 16, 3
    STRIDE, PAD = 1, 1

    key = jax.random.PRNGKey(0)
    kx, kw_, kb = jax.random.split(key, 3)

    x = jax.random.normal(kx, (N, CIN, H, W), dtype=jnp.float32)
    # init_para: nn.init.normal_(conv.weight, 0.0, 0.02)
    weight = 0.02 * jax.random.normal(kw_, (COUT, CIN, KS, KS), dtype=jnp.float32)
    # Conv2d default bias ~ U(-1/sqrt(fan_in), 1/sqrt(fan_in)), deterministic here.
    bound = 1.0 / np.sqrt(CIN * KS * KS)
    bias = jax.random.uniform(kb, (COUT,), minval=-bound, maxval=bound, dtype=jnp.float32)

    ref = jax.block_until_ready(_reference_forward(x, weight, bias, STRIDE, PAD))

    # Exercise the multi-tile HW path (HW=256 as 2 x 128 tiles) and the auto path.
    out_tiled = jax.block_until_ready(
        conv_block_forward(x, weight, bias, stride=STRIDE, padding=PAD, hw_tile=128))
    out_auto = jax.block_until_ready(
        conv_block_forward(x, weight, bias, stride=STRIDE, padding=PAD))

    # bf16 MXU operands introduce ~1e-2 quantization noise vs the pure-f32 reference.
    np.testing.assert_allclose(np.asarray(out_tiled), np.asarray(ref), atol=3e-2, rtol=3e-2)
    np.testing.assert_allclose(np.asarray(out_auto), np.asarray(ref), atol=3e-2, rtol=3e-2)

    print("KERNEL_OK")
</pallas_src>

<mosaic_0001>
module attributes {stable_mosaic.version = 11 : i64} {
  func.func @_convblock_kernel(%arg0: i32, %arg1: i32, %arg2: memref<1x36x128xbf16, #tpu.memory_space<vmem>>, %arg3: memref<8x36xbf16, #tpu.memory_space<vmem>>, %arg4: memref<8x1xf32, #tpu.memory_space<vmem>>, %arg5: memref<1x8x256xf32, #tpu.memory_space<vmem>>) attributes {dimension_semantics = [#tpu.dimension_semantics<parallel>, #tpu.dimension_semantics<arbitrary>], iteration_bounds = array<i64: 2, 2>, scalar_prefetch = 0 : i64, scratch_operands = 0 : i64, tpu.core_type = #tpu.core_type<tc>, window_params = [{transform_indices = @transform_0, window_bounds = array<i64: 1, 36, 128>}, {pipeline_mode = #tpu.pipeline_mode<synchronous>, transform_indices = @transform_1, window_bounds = array<i64: 8, 36>}, {pipeline_mode = #tpu.pipeline_mode<synchronous>, transform_indices = @transform_2, window_bounds = array<i64: 8, 1>}, {transform_indices = @transform_3, window_bounds = array<i64: 1, 8, 256>}]} {
    %c0 = arith.constant 0 : index
    %c0_0 = arith.constant 0 : index
    %0 = vector.load %arg3[%c0, %c0_0] : memref<8x36xbf16, #tpu.memory_space<vmem>>, vector<8x36xbf16>
    %c0_1 = arith.constant 0 : index
    %c0_2 = arith.constant 0 : index
    %c0_3 = arith.constant 0 : index
    %1 = vector.load %arg2[%c0_1, %c0_2, %c0_3] : memref<1x36x128xbf16, #tpu.memory_space<vmem>>, vector<1x36x128xbf16>
    %2 = vector.shape_cast %1 : vector<1x36x128xbf16> to vector<36x128xbf16>
    %cst = arith.constant dense<0.000000e+00> : vector<8x128xf32>
    %3 = tpu.matmul %0, %2, %cst {dimension_numbers = #tpu.dot_dimension_numbers<[1], [0], [0], [1], [0, 0, 1, 1], [], []>} : vector<8x36xbf16>, vector<36x128xbf16>, vector<8x128xf32> -> vector<8x128xf32>
    %c0_4 = arith.constant 0 : index
    %c0_5 = arith.constant 0 : index
    %4 = vector.load %arg4[%c0_4, %c0_5] : memref<8x1xf32, #tpu.memory_space<vmem>>, vector<8x1xf32>
    %5 = vector.broadcast %4 : vector<8x1xf32> to vector<8x128xf32>
    %6 = arith.addf %3, %5 : vector<8x128xf32>
    %c128_i32 = arith.constant 128 : i32
    %7 = arith.muli %arg1, %c128_i32 : i32
    %8 = tpu.assume_multiple %7, 128 : i32
    %c0_6 = arith.constant 0 : index
    %c0_7 = arith.constant 0 : index
    %9 = arith.index_cast %8 : i32 to index
    %10 = vector.load %arg5[%c0_6, %c0_7, %9] : memref<1x8x256xf32, #tpu.memory_space<vmem>>, vector<1x8x128xf32>
    %11 = vector.shape_cast %10 : vector<1x8x128xf32> to vector<8x128xf32>
    %12 = vector.shape_cast %6 : vector<8x128xf32> to vector<1x8x128xf32>
    tpu.vector_store %arg5[%c0_6, %c0_7, %9], %12 {strides = array<i32>} : memref<1x8x256xf32, #tpu.memory_space<vmem>>, vector<1x8x128xf32>,
    %c1_i32 = arith.constant 1 : i32
    %13 = arith.cmpi eq, %arg1, %c1_i32 : i32
    %14 = arith.extui %13 : i1 to i32
    %c0_i32 = arith.constant 0 : i32
    %15 = arith.cmpi ne, %14, %c0_i32 : i32
    scf.if %15 {
      %c0_8 = arith.constant 0 : index
      %c0_9 = arith.constant 0 : index
      %c0_10 = arith.constant 0 : index
      %16 = vector.load %arg5[%c0_8, %c0_9, %c0_10] : memref<1x8x256xf32, #tpu.memory_space<vmem>>, vector<1x8x256xf32>
      %17 = vector.shape_cast %16 : vector<1x8x256xf32> to vector<8x256xf32>
      %cst_11 = arith.constant dense<0.000000e+00> : vector<8xf32>
      %18 = vector.multi_reduction <add>, %17, %cst_11 [1] : vector<8x256xf32> to vector<8xf32>
      %19 = vector.shape_cast %18 : vector<8xf32> to vector<8x1xf32>
      %cst_12 = arith.constant 2.560000e+02 : f32
      %20 = vector.broadcast %cst_12 : f32 to vector<8x1xf32>
      %21 = arith.divf %19, %20 : vector<8x1xf32>
      %22 = vector.broadcast %21 : vector<8x1xf32> to vector<8x256xf32>
      %23 = arith.subf %17, %22 : vector<8x256xf32>
      %24 = arith.mulf %23, %23 : vector<8x256xf32>
      %cst_13 = arith.constant dense<0.000000e+00> : vector<8xf32>
      %25 = vector.multi_reduction <add>, %24, %cst_13 [1] : vector<8x256xf32> to vector<8xf32>
      %26 = vector.shape_cast %25 : vector<8xf32> to vector<8x1xf32>
      %cst_14 = arith.constant 2.560000e+02 : f32
      %27 = vector.broadcast %cst_14 : f32 to vector<8x1xf32>
      %28 = arith.divf %26, %27 : vector<8x1xf32>
      %cst_15 = arith.constant 9.99999974E-6 : f32
      %29 = vector.broadcast %cst_15 : f32 to vector<8x1xf32>
      %30 = arith.addf %28, %29 : vector<8x1xf32>
      %31 = math.rsqrt %30 : vector<8x1xf32>
      %32 = vector.broadcast %31 : vector<8x1xf32> to vector<8x256xf32>
      %33 = arith.mulf %23, %32 : vector<8x256xf32>
      %cst_16 = arith.constant 0.000000e+00 : f32
      %34 = vector.broadcast %cst_16 : f32 to vector<8x256xf32>
      %35 = arith.maximumf %33, %34 : vector<8x256xf32>
      %c0_17 = arith.constant 0 : index
      %c0_18 = arith.constant 0 : index
      %c0_19 = arith.constant 0 : index
      %36 = vector.load %arg5[%c0_17, %c0_18, %c0_19] : memref<1x8x256xf32, #tpu.memory_space<vmem>>, vector<1x8x256xf32>
      %37 = vector.shape_cast %36 : vector<1x8x256xf32> to vector<8x256xf32>
      %38 = vector.shape_cast %35 : vector<8x256xf32> to vector<1x8x256xf32>
      tpu.vector_store %arg5[%c0_17, %c0_18, %c0_19], %38 {strides = array<i32>} : memref<1x8x256xf32, #tpu.memory_space<vmem>>, vector<1x8x256xf32>,
    } else {
    }
    return
  }
  func.func @transform_0(%arg0: i32, %arg1: i32) -> (i32, i32, i32) {
    %c0_i32 = arith.constant 0 : i32
    %c0_i32_0 = arith.constant 0 : i32
    return %arg0, %c0_i32, %arg1 : i32, i32, i32
  }
  func.func @transform_1(%arg0: i32, %arg1: i32) -> (i32, i32) {
    %c0_i32 = arith.constant 0 : i32
    %c0_i32_0 = arith.constant 0 : i32
    %c0_i32_1 = arith.constant 0 : i32
    return %c0_i32, %c0_i32_0 : i32, i32
  }
  func.func @transform_2(%arg0: i32, %arg1: i32) -> (i32, i32) {
    %c0_i32 = arith.constant 0 : i32
    %c0_i32_0 = arith.constant 0 : i32
    %c0_i32_1 = arith.constant 0 : i32
    return %c0_i32, %c0_i32_0 : i32, i32
  }
  func.func @transform_3(%arg0: i32, %arg1: i32) -> (i32, i32, i32) {
    %c0_i32 = arith.constant 0 : i32
    %c0_i32_0 = arith.constant 0 : i32
    %c0_i32_1 = arith.constant 0 : i32
    return %arg0, %c0_i32, %c0_i32_0 : i32, i32, i32
  }
}

</mosaic_0001>

<bundles_post_ra>
// kernel: conv_block_forward.1
= control target key start
LH: loop header
LB: loop body
LE: loop exit
PB: predicated region body
PF: predicated region fallthrough
CT: control target
= control target key end

     0   :  { %s608_s12 = smov 0   ;;  %s610_s13 = smov 0   ;;  %s712_s0 = inlined_call_operand.vmem [shape: bf16[2,36,256], index: 0, kind: input, shape index: {}]   ;;  %s713_s1 = inlined_call_operand.vmem [shape: bf16[8,36], index: 1, kind: input, shape index: {}]   ;;  %s714_s2 = inlined_call_operand.vmem [shape: f32[8,1], index: 2, kind: input, shape index: {}]   ;;  %s715_s3 = inlined_call_operand.vmem [shape: f32[2,8,256], index: 3, kind: output, shape index: {}]  }
   0x1   :  { %s612_s14 = smov 0   ;;  %s614_s15 = smov 0  }
   0x2   :  { %s616_s16 = smov 0   ;;  %s618_s17 = smov 0  }
   0x3   :  { %s620_s18 = smov 0  }
   0x4 LB: > { %s22_s19 = sadd.s32 1, %s575_s16  ;;  %s25_s20 = sadd.s32 1, %s579_s17  ;;  %s583_s18 = sphi %s620_s18, %s13_s18   ;;  %s579_s17 = sphi %s618_s17, %s721_s17   ;;  %s575_s16 = sphi %s616_s16, %s720_s16   ;;  %s571_s15 = sphi %s614_s15, %s719_s15   ;;  %s567_s14 = sphi %s612_s14, %s718_s14   ;;  %s563_s13 = sphi %s610_s13, %s717_s13   ;;  %s559_s12 = sphi %s608_s12, %s716_s12  }
   0x5   : > { %p23_p0 = scmp.ge.s32.totalorder %s22_s19, 2  ;;  %p41_p1 = scmp.ne.s32.totalorder %s563_s13, %s559_s12 }
   0x6   : > { %p42_p2 = scmp.eq.s32.totalorder %s583_s18, 0  ;;  %s34_s24 = sadd.s32 1, %s563_s13 }
   0x7   : > { %s723_s19 = smov (%p23_p0, %s22_s19), 0  ;;  %s725_s20 = smov (!%p23_p0, %s25_s20), %s579_s17 }
   0x8   : > { %p43_p3 = por %p42_p2, %p41_p1  ;;  %p27_p4 = scmp.ge.s32.totalorder %s725_s20, 2 }
   0x9   : > { %s30_s21 = ssub.s32 %s575_s16, %s723_s19  ;;  %p432_p6 = scmp.ge.s32.totalorder %s583_s18, 4 }
   0xa   : > { %s727_s20 = smov (%p27_p4, %s725_s20), 0 }
   0xb   : > { %s29_s22 = ssub.s32 %s579_s17, %s727_s20  ;;  %141 = sbr.rel (%p432_p6) target bundleno = 28 (0x1c), region = 24 }
   0xc   : > { %s31_s23 = sor.u32 %s30_s21, %s29_s22 }
   0xd   : > { %p32_p5 = scmp.eq.s32.totalorder %s31_s23, 0 }
   0xf   : > { %s659_s25 = scalar_select %p32_p5, %s563_s13, %s34_s24  }
  0x12   : > { %144 = sbr.rel (!%p43_p3) target bundleno = 28 (0x1c), region = 28  ;;  %s146_s26 = sand.u32 (%p43_p3), 1, %s563_s13  }
  0x13   : > { %s462_s27 = smul.u32 (%p43_p3), 10, %s579_s17 }
  0x14   : > { %s461_s28 = smul.u32 (%p43_p3), 20, %s146_s26 }
  0x15   : > { %s150_s29 = sadd.s32 (%p43_p3), %s575_s16, %s462_s27 }
  0x16   : > { %s433_s30 = sshll.u32 (%p43_p3), %s150_s29, 2  ;;  %s148_s7 = scalar_lea.vmem (%p43_p3), [#allocation2], %s461_s28 }
  0x17   : > { %s152_s6 = scalar_lea.vmem (%p43_p3), %s712_s0, %s433_s30 }
  0x18   : > { %v168_v0 = vld [vmem:[%s152_s6] sm:$0xf] (%p43_p3)  ;;  %v170_v1 = vld [vmem:[%s152_s6 + $0x8] sm:$0xf] (%p43_p3)  ;;  %v172_v2 = vld [vmem:[%s152_s6 + $0x10] sm:$0xf] (%p43_p3) }
  0x19   : > { %169 = vst [vmem:[%s148_s7] sm:$0xf] %v168_v0  ;;  %171 = vst [vmem:[%s148_s7 + $0x4] sm:$0xf] %v170_v1  ;;  %v174_v3 = vld [vmem:[%s152_s6 + $0x18] sm:$0xf] }
  0x1a   : > { %173 = vst [vmem:[%s148_s7 + $0x8] sm:$0xf] %v172_v2  ;;  %v176_v4 = vld [vmem:[%s152_s6 + $0x20] sm:$0xf]  ;;  %175 = vst [vmem:[%s148_s7 + $0xc] sm:$0xf] %v174_v3 }
  0x1b   : > { %177 = vst [vmem:[%s148_s7 + $0x10] sm:$0xf] %v176_v4 }
  0x1c PF: > { %p434_p7 = scmp.ge.s32.totalorder %s583_s18, 1  ;;  %p209_p8 = scmp.lt.s32.totalorder %s583_s18, 5 }
  0x1e   : > { %p210_p9 = pnand %p434_p7, %p209_p8 }
  0x1f   : > { %s216_s8 = sand.u32 (!%p210_p9), 1, %s559_s12   ;;  %v585_v5 = vmov (!%p210_p9), 0.0   ;;  %vm586_vm0 = vmmov (!%p210_p9), 0   ;;  %v251_v6 = vld [vmem:[%s714_s2] sm:$0xff] (!%p210_p9)  ;;  %v587_v7 = vmov (!%p210_p9), 0   ;;  %vm276_vm1 = vcmask (!%p210_p9), 1041408  }
  0x20   : > { %213 = sbr.rel (%p210_p9) target bundleno = 584 (0x248), region = 69  ;;  %451 = vmatprep.subr.bf16.mxu0 (!%p210_p9), %v585_v5  ;;  %457 = vmatprep.mubr.msk.bf16.mxu0 (!%p210_p9), %vm586_vm0, %v585_v5  ;;  %v245_v12 = vld [vmem:[%s713_s1] sm:$0xf] (!%p210_p9)  ;;  %vm272_vm2 = vcmask (!%p210_p9), 293888   ;;  %p239_p10 = scmp.lt.s32.totalorder (!%p210_p9), %s571_s15, 1 }
  0x21   : > { %s463_s9 = smul.u32 (!%p210_p9), 20, %s216_s8  ;;  %523 = vset.pattern.permute.xlu0 (!%p210_p9), %v587_v7  ;;  %s441_s23 = sshll.u32 (!%p210_p9), %s567_s14, 7 }
  0x22   : > { %254 = vperm.xlu0 (!%p210_p9), %523, %v251_v6   ;;  %s321_s26 = sshra.s32 (!%p210_p9), %s441_s23, 7  ;;  %p443_p11 = scmp.ne.s32.totalorder (!%p210_p9), %s567_s14, 1 }
  0x23   : > { %s218_s21 = scalar_lea.vmem (!%p210_p9), [#allocation2], %s463_s9  ;;  %s442_s30 = sshll.u32 (!%p210_p9), %s321_s26, 3 }
  0x24   : > { %v524_v8 = vld [vmem:[%s218_s21] sm:$0xff] (!%p210_p9)   ;;  %v525_v9 = vld [vmem:[%s218_s21 + $0x8] sm:$0xff] (!%p210_p9)   ;;  %v526_v10 = vld [vmem:[%s218_s21 + $0x10] ss:$0 sps:$4 sm:$0x33] (!%p210_p9)  }
  0x25   : > { %452 = vmatpush3.bf16.msra.mxu0 (!%p210_p9), %v524_v8  ;;  %v278_v11 = vsel (!%p210_p9), %vm276_vm1, %v526_v10, 0 }
  0x26   : > { %453 = vmatprep.subr.bf16.mxu0 (!%p210_p9), %v585_v5 }
  0x27   : > { %s729_s15 = smov (!%p239_p10, %s571_s15), 1 }
  0x28   : > { %s446_s24 = sshll.u32 %s729_s15, 4 }
  0x29   : > { %454 = vmatpush3.bf16.msra.mxu0 %v525_v9  ;;  %s683_s29 = scalar_lea.vmem %s715_s3, %s446_s24 }
  0x2a   : > { %455 = vmatprep.subr.bf16.mxu0 %v585_v5  ;;  %s324_s4 = scalar_lea.vmem %s683_s29, %s442_s30 }
  0x2d   : > { %456 = vmatpush3.bf16.msra.mxu0 %v278_v11 }
  0x30   : > { %458 = vmatmul.mubr.msk.bf16.vlgmr.msra.gmra.mrb[0].mxu0 %vm272_vm2, %v245_v12 }
  0xa1   : > { %v255_v13 = vpop.permute.xlu0 %254 }
 0x100   : > { %329 = sbr.rel (%p443_p11) target bundleno = 584 (0x248), region = 77 }
 0x103   : > { %v314_v14 = vpop.f32.mrb[0].mxu0 }
 0x104   : > { %v315_v15 = vadd.f32 %v314_v14, %v255_v13  ;;  %v459_v16 = vpop.f32.mrb[1].mxu0 }
 0x105   : > { %v317_v17 = vpop.f32.mrb[2].mxu0 }
 0x106   : > { %325 = vst [vmem:[%s324_s4] sm:$0xff] %v315_v15  ;;  %v460_v18 = vpop.f32.mrb[3].mxu0 }
 0x10d   : > { %v330_v19 = vld [vmem:[%s683_s29] sm:$0xff]  ;;  %v331_v20 = vld [vmem:[%s683_s29 + $0x8] sm:$0xff] }
 0x10e   : > { %v332_v21 = vadd.f32 %v331_v20, %v330_v19 }
 0x110   : > { %333 = vadd.xlane.f32.xlu0 %v332_v21 }
 0x19d   : > { %v334_v22 = vpop.xlane.xlu0 %333 }
 0x19e   : > { %v336_v23 = vmul.f32 0.00390625, %v334_v22 }
 0x1a0   : > { %v337_v24 = vsub.f32 %v330_v19, %v336_v23  ;;  %v338_v25 = vsub.f32 %v331_v20, %v336_v23 }
 0x1a2   : > { %v339_v26 = vmul.f32 %v337_v24, %v337_v24  ;;  %v340_v27 = vmul.f32 %v338_v25, %v338_v25 }
 0x1a4   : > { %v341_v28 = vadd.f32 %v340_v27, %v339_v26 }
 0x1a6   : > { %342 = vadd.xlane.f32.xlu0 %v341_v28 }
 0x233   : > { %v343_v29 = vpop.xlane.xlu0 %342 }
 0x234   : > { %v344_v30 = vmul.f32 0.00390625, %v343_v29 }
 0x236   : > { %v345_v31 = vadd.f32 1e-05, %v344_v30 }
 0x238   : > { %527 = vrsqrt.f32 %v345_v31 }
 0x242   : > { %v528_v32 = vpop.eup %527 }
 0x243   : > { %v347_v33 = vmul.f32 %v528_v32, %v337_v24  ;;  %v348_v34 = vmul.f32 %v528_v32, %v338_v25 }
 0x245   : > { %v349_v35 = vmax.f32 %v347_v33, 0.0  ;;  %v350_v36 = vmax.f32 %v348_v34, 0.0 }
 0x247   : > { %351 = vst [vmem:[%s683_s29] sm:$0xff] %v349_v35  ;;  %352 = vst [vmem:[%s683_s29 + $0x8] sm:$0xff] %v350_v36 }
 0x248 PF: > { %s13_s18 = sadd.s32 1, %s583_s18   ;;  %s716_s12 = smov %s563_s13 }
 0x249   : > { %p10_p12 = scmp.ge.s32.totalorder %s13_s18, 6   ;;  %s717_s13 = smov %s659_s25 }
 0x24a   : > { %s718_s14 = smov %s575_s16  ;;  %s719_s15 = smov %s579_s17 }
 0x24b   : > { %s720_s16 = smov %s723_s19  ;;  %s721_s17 = smov %s727_s20 }
 0x24c   :  { %12 = sbr.rel (!%p10_p12) target bundleno = 4 (0x4), region = 113 }

</bundles_post_ra>
